<compile_context>
chip_gen: v7x
topology: tpu7x:2x2x1
jax: 0.10.0
libtpu: 0.0.40
codegen_flags: <defaults>
</compile_context>

<pallas_src>
import jax
import jax.numpy as jnp
from jax.experimental import pallas as pl
from jax.experimental.pallas import tpu as pltpu


def _hbm_copy_kernel(x_hbm_ref, o_hbm_ref, sem):
    # Single whole-array HBM->HBM DMA: the only cost is the unavoidable
    # 2*N bytes of HBM traffic that a materialized copy requires.  No VMEM
    # round trip, no vector loads/stores, no grid-step overhead, and no
    # (8, 128) / VMEM-capacity constraints on the input shape.
    copy = pltpu.make_async_copy(x_hbm_ref, o_hbm_ref, sem)
    copy.start()
    copy.wait()


def masked_prediction_forward(x: jax.Array, *, materialize: bool = True) -> jax.Array:
    """MaskedPredictionModule.forward — identity.

    materialize=False:  return `x` unchanged (zero HBM traffic; preferred
                        whenever a fresh buffer is not required).
    materialize=True:   produce a fresh output buffer via one whole-array
                        HBM->HBM DMA issued from a Pallas kernel.
    """
    if not materialize or x.size == 0:
        return x

    nbytes = int(x.size) * jnp.dtype(x.dtype).itemsize
    return pl.pallas_call(
        _hbm_copy_kernel,
        out_shape=jax.ShapeDtypeStruct(x.shape, x.dtype),
        in_specs=[pl.BlockSpec(memory_space=pl.ANY)],
        out_specs=pl.BlockSpec(memory_space=pl.ANY),
        scratch_shapes=[pltpu.SemaphoreType.DMA],
        cost_estimate=pl.CostEstimate(
            flops=0, transcendentals=0, bytes_accessed=2 * nbytes),
    )(x)


if __name__ == "__main__":
    key = jax.random.PRNGKey(0)

    # Shape consistent with the module's expected input (batch=2, seq=8, hidden=32).
    x_small = jax.random.normal(key, (2, 8, 32), dtype=jnp.float32)
    out_small = jax.block_until_ready(masked_prediction_forward(x_small))
    assert out_small.shape == x_small.shape and out_small.dtype == x_small.dtype
    assert jnp.array_equal(out_small, x_small), "identity mismatch (f32)"

    # bf16 input to confirm dtype preservation through the DMA path.
    x_bf16 = jax.random.normal(key, (2, 128, 256), dtype=jnp.bfloat16)
    out_bf16 = jax.block_until_ready(masked_prediction_forward(x_bf16))
    assert out_bf16.shape == x_bf16.shape and out_bf16.dtype == x_bf16.dtype
    assert jnp.array_equal(out_bf16, x_bf16), "identity mismatch (bf16)"

    # Awkward, non-(8,128)-friendly shape: previously hit the single-block
    # fallback; the whole-array DMA handles it with no tiling constraints.
    x_odd = jax.random.normal(key, (3, 7, 5), dtype=jnp.float32)
    out_odd = jax.block_until_ready(masked_prediction_forward(x_odd))
    assert out_odd.shape == x_odd.shape and out_odd.dtype == x_odd.dtype
    assert jnp.array_equal(out_odd, x_odd), "identity mismatch (odd shape)"

    # Zero-traffic path (pure identity).
    out_alias = jax.block_until_ready(
        masked_prediction_forward(x_small, materialize=False))
    assert jnp.array_equal(out_alias, x_small), "identity mismatch (no-copy path)"

    print("KERNEL_OK")
</pallas_src>

<mosaic_0001>
module attributes {stable_mosaic.version = 11 : i64} {
  func.func @_hbm_copy_kernel(%arg0: memref<2x8x32xf32, #tpu.memory_space<any>>, %arg1: memref<2x8x32xf32, #tpu.memory_space<any>>, %arg2: memref<!tpu.dma_semaphore, #tpu.memory_space<semaphore_mem>>) attributes {dimension_semantics = [], scalar_prefetch = 0 : i64, scratch_operands = 1 : i64, tpu.core_type = #tpu.core_type<tc>} {
    tpu.enqueue_dma source(%arg0 : memref<2x8x32xf32, #tpu.memory_space<any>>) target(%arg1 : memref<2x8x32xf32, #tpu.memory_space<any>>) target_semaphore(%arg2 : memref<!tpu.dma_semaphore, #tpu.memory_space<semaphore_mem>>)
    tpu.wait_dma2 semaphore(%arg2 : memref<!tpu.dma_semaphore, #tpu.memory_space<semaphore_mem>>) src(%arg0 : memref<2x8x32xf32, #tpu.memory_space<any>>) dst(%arg1 : memref<2x8x32xf32, #tpu.memory_space<any>>)
    return
  }
}

</mosaic_0001>

<bundles_post_ra>
// kernel: tpu_custom_call.1
= control target key start
LH: loop header
LB: loop body
LE: loop exit
PB: predicated region body
PF: predicated region fallthrough
CT: control target
= control target key end

     0   :  { %s35_s6 = smov [#allocation2]   ;;  %s36_s7 = smov [#allocation3]   ;;  %s54_s0 = inlined_call_operand.hbm [shape: f32[2,8,32], index: 0, kind: input, shape index: {}]   ;;  %s55_s1 = inlined_call_operand.hbm [shape: f32[2,8,32], index: 1, kind: output, shape index: {}]  }
   0x1   :  { %s37_s8 = smov 0  }
   0x2   :  { %18 = dma.general %s54_s0, 256, %s55_s1, %s35_s6, %s36_s7, [#allocation4], %s37_s8, 0  }
   0x3   :  { %33 = dma.done.wait [#allocation2], 256 }
   0x4   :  { %34 = vsyncadd [#allocation2], 4294967040 }
   0x5   :  { %23 = vsyncmov [#allocation2] }
   0x8   :  { %s24_s13 = vpop.sfrf %23 }
   0x9   :  { %p29_p0 = scmp.ne.s32.totalorder %s24_s13, 0 }
   0xb   :  { %28 = shalt.err (%p29_p0)  }

</bundles_post_ra>
